<compile_context>
chip_gen: v7x
topology: tpu7x:2x2x1
jax: 0.10.0
libtpu: 0.0.40
codegen_flags: <defaults>
</compile_context>

<pallas_src>
import functools
import math

import jax
import jax.numpy as jnp
from jax.experimental import pallas as pl
from jax.experimental.pallas import tpu as pltpu


# --------------------------------------------------------------------------
# helpers
# --------------------------------------------------------------------------
def _round_up(x: int, m: int) -> int:
    return ((x + m - 1) // m) * m


def _largest_divisor_tile(dim: int, cap: int, granule: int = 128) -> int:
    """Largest multiple of `granule` that divides `dim` and is <= cap.

    `dim` must itself be a multiple of `granule`.
    """
    best = granule
    t = granule
    limit = min(cap, dim)
    while t <= limit:
        if dim % t == 0:
            best = t
        t += granule
    return best


# --------------------------------------------------------------------------
# kernel 1: clean_diag  (run once per forward, O(D^2) VPU work total)
# --------------------------------------------------------------------------
def _make_clean_diag_kernel(d: int, original: bool, tile_rows: int):
    # torch.diag offsets: +d//2 and -d//2 (Python floor division).
    off_pos = d // 2
    off_neg = (-d) // 2

    def kernel(w_ref, o_ref):
        i = pl.program_id(0)
        blk = w_ref[...]
        rows, cols = blk.shape
        row = jax.lax.broadcasted_iota(jnp.int32, (rows, cols), 0) + i * tile_rows
        col = jax.lax.broadcasted_iota(jnp.int32, (rows, cols), 1)
        mask = row == col
        if not original:
            mask = mask | (col == row + off_pos) | (col == row + off_neg)
        o_ref[...] = jnp.where(mask, jnp.zeros_like(blk), blk).astype(o_ref.dtype)

    return kernel


# --------------------------------------------------------------------------
# kernel 2: tiled matmul  y = x @ w_clean
# --------------------------------------------------------------------------
def _matmul_kernel(x_ref, w_ref, o_ref, acc_ref, *, compute_dtype):
    @pl.when(pl.program_id(2) == 0)
    def _init():
        acc_ref[...] = jnp.zeros_like(acc_ref)

    # Cast inside the kernel (keeps HBM layout f32 for x; w_clean already in
    # compute dtype from the clean_diag kernel).
    x = x_ref[...].astype(compute_dtype)
    w = w_ref[...].astype(compute_dtype)
    acc_ref[...] += jnp.dot(x, w, preferred_element_type=jnp.float32)

    @pl.when(pl.program_id(2) == pl.num_programs(2) - 1)
    def _store():
        o_ref[...] = acc_ref[...].astype(o_ref.dtype)


# --------------------------------------------------------------------------
# wrapper
# --------------------------------------------------------------------------
def notears_linear_forward(
    x,
    W,
    *,
    original: bool = False,
    compute_dtype=jnp.float32,   # set jnp.bfloat16 on v6e/v7x if accuracy allows
    tm: int = 256,               # tile caps; actual tiles clamp to padded dims
    tn: int = 512,
    tk: int = 512,
):
    """x: (N, D) float32, W: (D, D) float32 -> (N, D) float32."""
    N, D = x.shape
    assert W.shape == (D, D)
    out_dtype = x.dtype

    # --- padding for lane density / exact tiling ---------------------------
    d_pad = _round_up(max(D, 128), 128)
    TN = _largest_divisor_tile(d_pad, tn, 128)
    TK = _largest_divisor_tile(d_pad, tk, 128)
    TM = min(_round_up(tm, 8), _round_up(max(N, 8), 8))
    m_pad = _round_up(max(N, 8), TM)

    # Zero padding keeps the extra rows/cols inert in the matmul.
    x_p = jnp.zeros((m_pad, d_pad), x.dtype).at[:N, :D].set(x)
    w_p = jnp.zeros((d_pad, d_pad), W.dtype).at[:D, :D].set(W)

    # --- pass 1: mask the diagonals once ------------------------------------
    TR = _largest_divisor_tile(d_pad, 256, 128)
    clean_kernel = _make_clean_diag_kernel(D, original, TR)
    w_clean = pl.pallas_call(
        clean_kernel,
        out_shape=jax.ShapeDtypeStruct((d_pad, d_pad), compute_dtype),
        grid=(d_pad // TR,),
        in_specs=[pl.BlockSpec((TR, d_pad), lambda i: (i, 0))],
        out_specs=pl.BlockSpec((TR, d_pad), lambda i: (i, 0)),
        compiler_params=pltpu.CompilerParams(
            dimension_semantics=("parallel",),
        ),
    )(w_p)

    # --- pass 2: tiled matmul ------------------------------------------------
    mt, nt, kt = m_pad // TM, d_pad // TN, d_pad // TK
    kernel = functools.partial(_matmul_kernel, compute_dtype=compute_dtype)

    c_bytes = jnp.finfo(compute_dtype).bits // 8
    flops = 2 * m_pad * d_pad * d_pad
    bytes_accessed = (
        m_pad * d_pad * 4 * nt          # x tiles (re-read per N tile)
        + d_pad * d_pad * c_bytes * mt  # w_clean tiles (re-read per M tile)
        + m_pad * d_pad * 4             # output
    )
    vmem_est = (
        2 * TM * TK * 4        # double-buffered x tiles (f32)
        + 2 * TK * TN * c_bytes  # double-buffered w tiles
        + 2 * TM * TN * 4      # double-buffered out tiles
        + TM * TN * 4          # accumulator
    )
    vmem_limit = int(min(max(3 * vmem_est, 16 * 1024 * 1024), 48 * 1024 * 1024))

    out_p = pl.pallas_call(
        kernel,
        out_shape=jax.ShapeDtypeStruct((m_pad, d_pad), out_dtype),
        grid=(mt, nt, kt),
        in_specs=[
            pl.BlockSpec((TM, TK), lambda i, j, k: (i, k)),
            pl.BlockSpec((TK, TN), lambda i, j, k: (k, j)),
        ],
        out_specs=pl.BlockSpec((TM, TN), lambda i, j, k: (i, j)),
        scratch_shapes=[pltpu.VMEM((TM, TN), jnp.float32)],
        compiler_params=pltpu.CompilerParams(
            dimension_semantics=("parallel", "parallel", "arbitrary"),
            vmem_limit_bytes=vmem_limit,
        ),
        cost_estimate=pl.CostEstimate(
            flops=int(flops), transcendentals=0, bytes_accessed=int(bytes_accessed)
        ),
    )(x_p, w_clean)

    return out_p[:N, :D]


# --------------------------------------------------------------------------
# pure-JAX reference (mirrors the torch clean_diag + matmul)
# --------------------------------------------------------------------------
def _clean_diag_ref(W, original: bool):
    d = W.shape[0]
    off_pos = d // 2
    off_neg = (-d) // 2
    row = jnp.arange(d)[:, None]
    col = jnp.arange(d)[None, :]
    mask = row == col
    if not original:
        mask = mask | (col == row + off_pos) | (col == row + off_neg)
    return jnp.where(mask, 0.0, W)


# TODO(synk): h_func (trace_expm), l2_reg, fc1_l1_reg, fc1_to_adj are auxiliary
# methods not on the forward() path and are not implemented here.

if __name__ == "__main__":
    key = jax.random.PRNGKey(0)
    kx, kw, kx2, kw2 = jax.random.split(key, 4)

    # --- Test 1: module-scale shapes (d=8 variables, batch of 16) ----------
    d, n = 8, 16
    original = False
    # Deterministic kaiming_uniform_(a=sqrt(5)) init: bound = 1/sqrt(fan_in)
    bound = 1.0 / math.sqrt(d)
    W = jax.random.uniform(kw, (d, d), dtype=jnp.float32, minval=-bound, maxval=bound)
    x = jax.random.normal(kx, (n, d), dtype=jnp.float32)

    y = jax.block_until_ready(notears_linear_forward(x, W, original=False))
    y_ref = x @ _clean_diag_ref(W, False)
    assert jnp.allclose(y, y_ref, atol=1e-4, rtol=1e-4), "mismatch (original=False)"

    y_o = jax.block_until_ready(notears_linear_forward(x, W, original=True))
    y_o_ref = x @ _clean_diag_ref(W, True)
    assert jnp.allclose(y_o, y_o_ref, atol=1e-4, rtol=1e-4), "mismatch (original=True)"

    # --- Test 2: exercise M/N/K tiling, accumulator and padding ------------
    d2, n2 = 256, 72
    bound2 = 1.0 / math.sqrt(d2)
    W2 = jax.random.uniform(kw2, (d2, d2), dtype=jnp.float32,
                            minval=-bound2, maxval=bound2)
    x2 = jax.random.normal(kx2, (n2, d2), dtype=jnp.float32)
    y2 = jax.block_until_ready(
        notears_linear_forward(x2, W2, original=False, tm=32, tn=128, tk=128)
    )
    y2_ref = x2 @ _clean_diag_ref(W2, False)
    assert jnp.allclose(y2, y2_ref, atol=5e-3, rtol=5e-3), "mismatch (tiled path)"

    print("KERNEL_OK")
</pallas_src>

<mosaic_0001>
module attributes {stable_mosaic.version = 11 : i64} {
  func.func @kernel(%arg0: i32, %arg1: memref<128x128xf32, #tpu.memory_space<vmem>>, %arg2: memref<128x128xf32, #tpu.memory_space<vmem>>) attributes {dimension_semantics = [#tpu.dimension_semantics<parallel>], iteration_bounds = array<i64: 1>, scalar_prefetch = 0 : i64, scratch_operands = 0 : i64, tpu.core_type = #tpu.core_type<tc>, window_params = [{transform_indices = @transform_0, window_bounds = array<i64: 128, 128>}, {transform_indices = @transform_1, window_bounds = array<i64: 128, 128>}]} {
    %c0 = arith.constant 0 : index
    %c0_0 = arith.constant 0 : index
    %0 = vector.load %arg1[%c0, %c0_0] : memref<128x128xf32, #tpu.memory_space<vmem>>, vector<128x128xf32>
    %1 = tpu.iota {dimensions = array<i32: 0>} : vector<128x128xi32>
    %c128_i32 = arith.constant 128 : i32
    %2 = arith.muli %arg0, %c128_i32 : i32
    %3 = vector.broadcast %2 : i32 to vector<128x128xi32>
    %4 = arith.addi %1, %3 : vector<128x128xi32>
    %5 = tpu.iota {dimensions = array<i32: 1>} : vector<128x128xi32>
    %6 = arith.cmpi eq, %4, %5 : vector<128x128xi32>
    %c4_i32 = arith.constant 4 : i32
    %7 = vector.broadcast %c4_i32 : i32 to vector<128x128xi32>
    %8 = arith.addi %4, %7 : vector<128x128xi32>
    %9 = arith.cmpi eq, %5, %8 : vector<128x128xi32>
    %10 = arith.ori %6, %9 : vector<128x128xi1>
    %c-4_i32 = arith.constant -4 : i32
    %11 = vector.broadcast %c-4_i32 : i32 to vector<128x128xi32>
    %12 = arith.addi %4, %11 : vector<128x128xi32>
    %13 = arith.cmpi eq, %5, %12 : vector<128x128xi32>
    %14 = arith.ori %10, %13 : vector<128x128xi1>
    %cst = arith.constant 0.000000e+00 : f32
    %15 = vector.broadcast %cst : f32 to vector<128x128xf32>
    %16 = arith.select %14, %15, %0 : vector<128x128xi1>, vector<128x128xf32>
    %c0_1 = arith.constant 0 : index
    %c0_2 = arith.constant 0 : index
    %17 = vector.load %arg2[%c0_1, %c0_2] : memref<128x128xf32, #tpu.memory_space<vmem>>, vector<128x128xf32>
    tpu.vector_store %arg2[%c0_1, %c0_2], %16 {strides = array<i32>} : memref<128x128xf32, #tpu.memory_space<vmem>>, vector<128x128xf32>,
    return
  }
  func.func @transform_0(%arg0: i32) -> (i32, i32) {
    %c0_i32 = arith.constant 0 : i32
    %c0_i32_0 = arith.constant 0 : i32
    return %arg0, %c0_i32 : i32, i32
  }
  func.func @transform_1(%arg0: i32) -> (i32, i32) {
    %c0_i32 = arith.constant 0 : i32
    %c0_i32_0 = arith.constant 0 : i32
    return %arg0, %c0_i32 : i32, i32
  }
}

</mosaic_0001>

<bundles_post_ra>
// kernel: tpu_custom_call.1
= control target key start
LH: loop header
LB: loop body
LE: loop exit
PB: predicated region body
PF: predicated region fallthrough
CT: control target
= control target key end

     0   :  { %6 = vsyncpa [#allocation3], 0  ;;  %s455_s0 = inlined_call_operand.hbm [shape: f32[128,128], index: 0, kind: input, shape index: {}]   ;;  %s456_s1 = inlined_call_operand.hbm [shape: f32[128,128], index: 1, kind: output, shape index: {}]  }
   0x1   :  { %7 = vsyncpa [#allocation4], 0  ;;  %s289_s6 = smov [#allocation2]   ;;  %s241_s10 = scalar_lea.hbm %s455_s0, 2048 }
   0x2   :  { %s13_s7 = sshll.u32 %s289_s6, 4  ;;  %p242_p0 = scmp.ne.s32.totalorder %s455_s0, %s241_s10  ;;  %s14_s7 = int_to_ptr.vmem [resolvable:$true] %s13_s7 }
   0x3   :  { %p245_p1 = scmp.lt.u32.totalorder %s241_s10, %s455_s0 }
   0x5   :  { %p247_p2 = pnand %p245_p1, %p242_p0 }
   0x7   :  { %250 = shalt.err (!%p247_p2)
}
   0x8   :  { %s251_s15 = scalar_lea.vmem %s14_s7, 2048  ;;  %p256_p4 = scmp.lt.s32.totalorder %s14_s7, %s14_s7 }
   0x9   :  { %p252_p3 = scmp.ne.s32.totalorder %s14_s7, %s251_s15  ;;  %p257_p5 = scmp.lt.s32.totalorder %s251_s15, %s251_s15 }
   0xb   :  { %p258_p6 = por %p257_p5, %p256_p4 }
   0xd   :  { %p259_p7 = pnand %p258_p6, %p252_p3 }
   0xf   :  { %262 = shalt.err (!%p259_p7)
}
  0x10   :  { %s290_s16 = smov 128   ;;  %s291_s17 = smov 8  }
  0x11   :  { %19 = dma.hbm_to_vmem [thread:$0]  %s455_s0, 2048, %s14_s7, [#allocation3], %s290_s16, %s290_s16, %s291_s17  }
  0x12   :  { %285 = dma.done.wait [#allocation3], 2048  }
  0x13   :  { %286 = vsyncadd [#allocation3], 4294965248  ;;  %v39_v0 = vlaneseq  ;;  %v23_v10 = vld [vmem:[#allocation2] sm:$0xff]  ;;  %v24_v15 = vld [vmem:[#allocation2 + $0x8] sm:$0xff]  ;;  %s292_s0 = smov [#allocation5]  }
  0x14   :  { %v25_v19 = vld [vmem:[#allocation2 + $0x10] sm:$0xff]  ;;  %v26_v24 = vld [vmem:[#allocation2 + $0x18] sm:$0xff]  ;;  %v27_v30 = vld [vmem:[#allocation2 + $0x20] sm:$0xff]  ;;  %s225_s20 = sshll.u32 %s292_s0, 4  ;;  %s226_s20 = int_to_ptr.vmem [resolvable:$true] %s225_s20 }
  0x15   :  { %v318_v1 = vshrl.u32 %v39_v0, 7  ;;  %v320_v2 = vand.u32 127, %v39_v0  ;;  %v28_v36 = vld [vmem:[#allocation2 + $0x28] sm:$0xff]  ;;  %v29_v40 = vld [vmem:[#allocation2 + $0x30] sm:$0xff]  ;;  %v30_v45 = vld [vmem:[#allocation2 + $0x38] sm:$0xff]  ;;  %s263_s21 = scalar_lea.vmem %s226_s20, 2048  ;;  %p268_p9 = scmp.lt.s32.totalorder %s226_s20, %s226_s20 }
  0x16   :  { %v31_v52 = vld [vmem:[#allocation2 + $0x40] sm:$0xff]  ;;  %v32_v57 = vld [vmem:[#allocation2 + $0x48] sm:$0xff]  ;;  %v33_v61 = vld [vmem:[#allocation2 + $0x50] sm:$0xff]  ;;  %p264_p8 = scmp.ne.s32.totalorder %s226_s20, %s263_s21  ;;  %p269_p10 = scmp.lt.s32.totalorder %s263_s21, %s263_s21 }
  0x17   :  { %vm76_vm0 = vcmp.eq.s32.totalorder %v318_v1, %v320_v2  ;;  %v92_v3 = vadd.s32 4, %v318_v1  ;;  %v140_v4 = vadd.s32 4294967292, %v318_v1  ;;  %v41_v5 = vadd.s32 8, %v318_v1 }
  0x18   :  { %v42_v6 = vadd.s32 16, %v318_v1  ;;  %v43_v7 = vadd.s32 24, %v318_v1  ;;  %v44_v8 = vadd.s32 32, %v318_v1  ;;  %v45_v14 = vadd.s32 40, %v318_v1  ;;  %p270_p11 = por %p269_p10, %p268_p9 }
  0x19   :  { %vm108_vm1 = vcmp.eq.s32.totalorder %v320_v2, %v92_v3  ;;  %vm156_vm2 = vcmp.eq.s32.totalorder %v320_v2, %v140_v4  ;;  %vm77_vm3 = vcmp.eq.s32.totalorder %v41_v5, %v320_v2  ;;  %v93_v9 = vadd.s32 4, %v41_v5 }
  0x1a   :  { %vm124_vm4 = vmor %vm76_vm0, %vm108_vm1  ;;  %v141_v11 = vadd.s32 4294967292, %v41_v5  ;;  %v94_v12 = vadd.s32 4, %v42_v6  ;;  %v142_v13 = vadd.s32 4294967292, %v42_v6  ;;  %vm78_vm7 = vcmp.eq.s32.totalorder %v42_v6, %v320_v2  ;;  %v34_v5 = vld [vmem:[#allocation2 + $0x58] sm:$0xff]  ;;  %p271_p12 = pnand %p270_p11, %p264_p8 }
  0x1b   :  { %vm172_vm5 = vmor %vm124_vm4, %vm156_vm2  ;;  %vm109_vm6 = vcmp.eq.s32.totalorder %v320_v2, %v93_v9  ;;  %v95_v16 = vadd.s32 4, %v43_v7  ;;  %v143_v17 = vadd.s32 4294967292, %v43_v7  ;;  %vm79_vm13 = vcmp.eq.s32.totalorder %v43_v7, %v320_v2 }
  0x1c   :  { %v188_v18 = vsel %vm172_vm5, 0.0, %v23_v10  ;;  %vm125_vm8 = vmor %vm77_vm3, %vm109_vm6  ;;  %vm157_vm9 = vcmp.eq.s32.totalorder %v320_v2, %v141_v11  ;;  %vm110_vm10 = vcmp.eq.s32.totalorder %v320_v2, %v94_v12  ;;  %vm158_vm11 = vcmp.eq.s32.totalorder %v320_v2, %v142_v13  ;;  %v36_v12 = vld [vmem:[#allocation2 + $0x68] sm:$0xff] }
  0x1d   :  { %204 = vst [vmem:[#allocation5] sm:$0xff] %v188_v18  ;;  %vm173_vm12 = vmor %vm125_vm8, %vm157_vm9  ;;  %vm111_vm14 = vcmp.eq.s32.totalorder %v320_v2, %v95_v16  ;;  %vm159_vm15 = vcmp.eq.s32.totalorder %v320_v2, %v143_v17  ;;  %v96_v20 = vadd.s32 4, %v44_v8  ;;  %vm80_vm1 = vcmp.eq.s32.totalorder %v44_v8, %v320_v2  ;;  %v38_v16 = vld [vmem:[#allocation2 + $0x78] sm:$0xff] }
  0x1e   :  { %v189_v21 = vsel %vm173_vm12, 0.0, %v24_v15  ;;  %vm126_vm0 = vmor %vm78_vm7, %vm110_vm10  ;;  %v144_v22 = vadd.s32 4294967292, %v44_v8  ;;  %v97_v23 = vadd.s32 4, %v45_v14  ;;  %v145_v25 = vadd.s32 4294967292, %v45_v14  ;;  %v35_v8 = vld [vmem:[#allocation2 + $0x60] sm:$0xff] }
  0x1f   :  { %205 = vst [vmem:[#allocation5 + $0x8] sm:$0xff] %v189_v21  ;;  %vm174_vm2 = vmor %vm126_vm0, %vm158_vm11  ;;  %vm112_vm3 = vcmp.eq.s32.totalorder %v320_v2, %v96_v20  ;;  %v46_v26 = vadd.s32 48, %v318_v1  ;;  %v47_v27 = vadd.s32 56, %v318_v1  ;;  %v48_v29 = vadd.s32 64, %v318_v1 }
  0x20   :  { %v190_v28 = vsel %vm174_vm2, 0.0, %v25_v19  ;;  %vm127_vm4 = vmor %vm79_vm13, %vm111_vm14  ;;  %vm160_vm5 = vcmp.eq.s32.totalorder %v320_v2, %v144_v22  ;;  %vm81_vm7 = vcmp.eq.s32.totalorder %v45_v14, %v320_v2  ;;  %vm113_vm8 = vcmp.eq.s32.totalorder %v320_v2, %v97_v23  ;;  %v37_v14 = vld [vmem:[#allocation2 + $0x70] sm:$0xff] }
  0x21   :  { %206 = vst [vmem:[#allocation5 + $0x10] sm:$0xff] %v190_v28  ;;  %vm175_vm6 = vmor %vm127_vm4, %vm159_vm15  ;;  %v98_v31 = vadd.s32 4, %v46_v26  ;;  %v146_v32 = vadd.s32 4294967292, %v46_v26  ;;  %vm161_vm10 = vcmp.eq.s32.totalorder %v320_v2, %v145_v25  ;;  %v99_v34 = vadd.s32 4, %v47_v27 }
  0x22   :  { %v191_v33 = vsel %vm175_vm6, 0.0, %v26_v24  ;;  %vm128_vm9 = vmor %vm80_vm1, %vm112_vm3  ;;  %v147_v35 = vadd.s32 4294967292, %v47_v27  ;;  %vm82_vm12 = vcmp.eq.s32.totalorder %v46_v26, %v320_v2  ;;  %v100_v37 = vadd.s32 4, %v48_v29 }
  0x23   :  { %207 = vst [vmem:[#allocation5 + $0x18] sm:$0xff] %v191_v33  ;;  %vm176_vm11 = vmor %vm128_vm9, %vm160_vm5  ;;  %vm114_vm13 = vcmp.eq.s32.totalorder %v320_v2, %v98_v31  ;;  %vm162_vm15 = vcmp.eq.s32.totalorder %v320_v2, %v146_v32  ;;  %vm83_vm0 = vcmp.eq.s32.totalorder %v47_v27, %v320_v2  ;;  %v148_v39 = vadd.s32 4294967292, %v48_v29 }
  0x24   :  { %v192_v38 = vsel %vm176_vm11, 0.0, %v27_v30  ;;  %vm129_vm14 = vmor %vm81_vm7, %vm113_vm8  ;;  %vm115_vm2 = vcmp.eq.s32.totalorder %v320_v2, %v99_v34  ;;  %v49_v41 = vadd.s32 72, %v318_v1  ;;  %v50_v42 = vadd.s32 80, %v318_v1 }
  0x25   :  { %208 = vst [vmem:[#allocation5 + $0x20] sm:$0xff] %v192_v38  ;;  %vm177_vm1 = vmor %vm129_vm14, %vm161_vm10  ;;  %v51_v43 = vadd.s32 88, %v318_v1  ;;  %vm163_vm4 = vcmp.eq.s32.totalorder %v320_v2, %v147_v35  ;;  %vm84_vm5 = vcmp.eq.s32.totalorder %v48_v29, %v320_v2  ;;  %vm116_vm7 = vcmp.eq.s32.totalorder %v320_v2, %v100_v37 }
  0x26   :  { %v193_v44 = vsel %vm177_vm1, 0.0, %v28_v36  ;;  %vm130_vm3 = vmor %vm82_vm12, %vm114_vm13  ;;  %v101_v46 = vadd.s32 4, %v49_v41  ;;  %v149_v47 = vadd.s32 4294967292, %v49_v41  ;;  %v52_v48 = vadd.s32 96, %v318_v1 }
  0x27   :  { %209 = vst [vmem:[#allocation5 + $0x28] sm:$0xff] %v193_v44  ;;  %vm178_vm6 = vmor %vm130_vm3, %vm162_vm15  ;;  %vm164_vm9 = vcmp.eq.s32.totalorder %v320_v2, %v148_v39  ;;  %v102_v50 = vadd.s32 4, %v50_v42  ;;  %v150_v51 = vadd.s32 4294967292, %v50_v42  ;;  %vm85_vm11 = vcmp.eq.s32.totalorder %v49_v41, %v320_v2 }
  0x28   :  { %v194_v49 = vsel %vm178_vm6, 0.0, %v29_v40  ;;  %vm131_vm8 = vmor %vm83_vm0, %vm115_vm2  ;;  %vm117_vm12 = vcmp.eq.s32.totalorder %v320_v2, %v101_v46  ;;  %v103_v53 = vadd.s32 4, %v51_v43  ;;  %v53_v54 = vadd.s32 104, %v318_v1 }
  0x29   :  { %210 = vst [vmem:[#allocation5 + $0x30] sm:$0xff] %v194_v49  ;;  %vm179_vm10 = vmor %vm131_vm8, %vm163_vm4  ;;  %vm165_vm14 = vcmp.eq.s32.totalorder %v320_v2, %v149_v47  ;;  %v151_v56 = vadd.s32 4294967292, %v51_v43  ;;  %vm86_vm0 = vcmp.eq.s32.totalorder %v50_v42, %v320_v2  ;;  %vm118_vm1 = vcmp.eq.s32.totalorder %v320_v2, %v102_v50 }
  0x2a   :  { %v195_v55 = vsel %vm179_vm10, 0.0, %v30_v45  ;;  %vm132_vm13 = vmor %vm84_vm5, %vm116_vm7  ;;  %v104_v58 = vadd.s32 4, %v52_v48  ;;  %vm166_vm3 = vcmp.eq.s32.totalorder %v320_v2, %v150_v51  ;;  %vm87_vm4 = vcmp.eq.s32.totalorder %v51_v43, %v320_v2 }
  0x2b   :  { %211 = vst [vmem:[#allocation5 + $0x38] sm:$0xff] %v195_v55  ;;  %vm180_vm15 = vmor %vm132_vm13, %vm164_vm9  ;;  %v152_v60 = vadd.s32 4294967292, %v52_v48  ;;  %vm119_vm6 = vcmp.eq.s32.totalorder %v320_v2, %v103_v53  ;;  %v105_v62 = vadd.s32 4, %v53_v54  ;;  %v54_v63 = vadd.s32 112, %v318_v1 }
  0x2c   :  { %v196_v59 = vsel %vm180_vm15, 0.0, %v31_v52  ;;  %vm133_vm2 = vmor %vm85_vm11, %vm117_vm12  ;;  %v55_v0 = vadd.s32 120, %v318_v1  ;;  %vm167_vm8 = vcmp.eq.s32.totalorder %v320_v2, %v151_v56  ;;  %v153_v4 = vadd.s32 4294967292, %v53_v54 }
  0x2d   :  { %212 = vst [vmem:[#allocation5 + $0x40] sm:$0xff] %v196_v59  ;;  %vm181_vm5 = vmor %vm133_vm2, %vm165_vm14  ;;  %vm88_vm10 = vcmp.eq.s32.totalorder %v52_v48, %v320_v2  ;;  %vm120_vm11 = vcmp.eq.s32.totalorder %v320_v2, %v104_v58  ;;  %v106_v6 = vadd.s32 4, %v54_v63  ;;  %vm168_vm13 = vcmp.eq.s32.totalorder %v320_v2, %v152_v60 }
  0x2e   :  { %v197_v3 = vsel %vm181_vm5, 0.0, %v32_v57  ;;  %vm134_vm7 = vmor %vm86_vm0, %vm118_vm1  ;;  %v154_v7 = vadd.s32 4294967292, %v54_v63  ;;  %vm89_vm15 = vcmp.eq.s32.totalorder %v53_v54, %v320_v2  ;;  %vm121_vm0 = vcmp.eq.s32.totalorder %v320_v2, %v105_v62 }
  0x2f   :  { %213 = vst [vmem:[#allocation5 + $0x48] sm:$0xff] %v197_v3  ;;  %vm182_vm9 = vmor %vm134_vm7, %vm166_vm3  ;;  %v107_v9 = vadd.s32 4, %v55_v0  ;;  %vm169_vm2 = vcmp.eq.s32.totalorder %v320_v2, %v153_v4  ;;  %v155_v11 = vadd.s32 4294967292, %v55_v0  ;;  %vm122_vm5 = vcmp.eq.s32.totalorder %v320_v2, %v106_v6 }
  0x30   :  { %v198_v1 = vsel %vm182_vm9, 0.0, %v33_v61  ;;  %vm135_vm12 = vmor %vm87_vm4, %vm119_vm6  ;;  %vm90_vm4 = vcmp.eq.s32.totalorder %v54_v63, %v320_v2  ;;  %vm170_vm7 = vcmp.eq.s32.totalorder %v320_v2, %v154_v7  ;;  %vm91_vm9 = vcmp.eq.s32.totalorder %v55_v0, %v320_v2 }
  0x31   :  { %214 = vst [vmem:[#allocation5 + $0x50] sm:$0xff] %v198_v1  ;;  %vm183_vm14 = vmor %vm135_vm12, %vm167_vm8  ;;  %vm171_vm12 = vcmp.eq.s32.totalorder %v320_v2, %v155_v11 }
  0x32   :  { %v199_v10 = vsel %vm183_vm14, 0.0, %v34_v5  ;;  %vm136_vm1 = vmor %vm88_vm10, %vm120_vm11  ;;  %vm123_vm10 = vcmp.eq.s32.totalorder %v320_v2, %v107_v9 }
  0x33   :  { %215 = vst [vmem:[#allocation5 + $0x58] sm:$0xff] %v199_v10  ;;  %vm184_vm3 = vmor %vm136_vm1, %vm168_vm13 }
  0x34   :  { %v200_v13 = vsel %vm184_vm3, 0.0, %v35_v8  ;;  %vm137_vm6 = vmor %vm89_vm15, %vm121_vm0 }
  0x35   :  { %216 = vst [vmem:[#allocation5 + $0x60] sm:$0xff] %v200_v13  ;;  %vm185_vm8 = vmor %vm137_vm6, %vm169_vm2 }
  0x36   :  { %v201_v15 = vsel %vm185_vm8, 0.0, %v36_v12  ;;  %vm138_vm11 = vmor %vm90_vm4, %vm122_vm5 }
  0x37   :  { %217 = vst [vmem:[#allocation5 + $0x68] sm:$0xff] %v201_v15  ;;  %vm186_vm13 = vmor %vm138_vm11, %vm170_vm7 }
  0x38   :  { %v202_v17 = vsel %vm186_vm13, 0.0, %v37_v14  ;;  %vm139_vm14 = vmor %vm91_vm9, %vm123_vm10 }
  0x39   :  { %218 = vst [vmem:[#allocation5 + $0x70] sm:$0xff] %v202_v17  ;;  %vm187_vm15 = vmor %vm139_vm14, %vm171_vm12 }
  0x3a   :  { %v203_v18 = vsel %vm187_vm15, 0.0, %v38_v16 }
  0x3b   :  { %219 = vst [vmem:[#allocation5 + $0x78] sm:$0xff] %v203_v18 }
  0x3c   :  { %274 = shalt.err (!%p271_p12)
}
  0x3d   :  { %s275_s24 = scalar_lea.hbm %s456_s1, 2048 }
  0x3e   :  { %p276_p13 = scmp.ne.s32.totalorder %s456_s1, %s275_s24  ;;  %p279_p0 = scmp.lt.u32.totalorder %s275_s24, %s456_s1 }
  0x40   :  { %p281_p1 = pnand %p279_p0, %p276_p13 }
  0x42   :  { %284 = shalt.err (!%p281_p1)
}
  0x43   :  { %231 = dma.vmem_to_hbm [thread:$0]  %s226_s20, 2048, %s456_s1, [#allocation4], %s290_s16, %s290_s16, %s291_s17  }
  0x44   :  { %287 = dma.done.wait [#allocation4], 2048  }
  0x45   :  { %288 = vsyncadd [#allocation4], 4294965248 }
  0x46   :  { %235 = vsyncpa [#allocation3], 1 }
  0x47   :  { %236 = vsyncpa [#allocation4], 1 }

</bundles_post_ra>
